<compile_context>
chip_gen: v7x
topology: tpu7x:2x2x1
jax: 0.10.0
libtpu: 0.0.40
codegen_flags: <defaults>
</compile_context>

<pallas_src>
import functools

import jax
import jax.numpy as jnp
from jax.experimental import pallas as pl
from jax.experimental.pallas import tpu as pltpu


def _denom_kernel(zrow_ref, zcol_ref, out_ref, *,
                  inv_t: float, tm: int, tn: int,
                  half_valid: int, half_pad: int):
    i = pl.program_id(0)          # row block   (parallel)
    k = pl.program_id(1)          # column block (reduction / arbitrary)

    @pl.when(k == 0)
    def _init():
        out_ref[...] = jnp.zeros_like(out_ref)

    # sim tile on the MXU: bf16 operands, f32 accumulation; rhs is already
    # [Dp, tn] so no transpose/relayout is needed in the kernel.
    s = jnp.dot(zrow_ref[...], zcol_ref[...],
                preferred_element_type=jnp.float32)          # [tm, tn]
    e = jnp.exp(s * jnp.float32(inv_t))                      # EUP

    row0 = i * tm
    col0 = k * tn

    has_pad = half_pad != half_valid                          # static
    # Scalar tile-overlap tests: only tiles touching the diagonal or padded
    # columns pay for the iota/compare/select masking path.
    diag_overlap = jnp.logical_and(row0 < col0 + tn, col0 < row0 + tm)
    if has_pad:
        pad_lo = jnp.logical_and(col0 < half_pad, col0 + tn > half_valid)
        pad_hi = col0 + tn > half_pad + half_valid
        needs_mask = jnp.logical_or(diag_overlap,
                                    jnp.logical_or(pad_lo, pad_hi))
    else:
        needs_mask = diag_overlap

    def lane_group_sum(x):
        # Lane-blocked VPU accumulation: sum 128-wide column groups with
        # elementwise adds (static lane-group slices -> no relayout, no XLU).
        acc = x[:, 0:128]
        for g in range(1, tn // 128):
            acc = acc + x[:, g * 128:(g + 1) * 128]
        return acc

    @pl.when(needs_mask)
    def _masked():
        rg = row0 + jax.lax.broadcasted_iota(jnp.int32, (tm, tn), 0)
        cg = col0 + jax.lax.broadcasted_iota(jnp.int32, (tm, tn), 1)
        drop = rg == cg                                      # self-similarity
        if has_pad:
            # zero-padded rows normalize to 0 -> exp(0)=1: must be excluded
            col_invalid = jnp.logical_or(
                jnp.logical_and(cg >= half_valid, cg < half_pad),
                cg >= half_pad + half_valid)
            drop = jnp.logical_or(drop, col_invalid)
        out_ref[...] += lane_group_sum(
            jnp.where(drop, jnp.float32(0.0), e))

    @pl.when(jnp.logical_not(needs_mask))
    def _plain():
        out_ref[...] += lane_group_sum(e)


def _choose_tiles(B: int, Dp: int, tile_m=None, tile_n=None):
    """Pick (tm, tn) under a 32 MiB double-buffered input-tile budget."""
    budget = 32 << 20
    if tile_m is None:
        tm = 128
        for cand in (1024, 512, 256):
            if cand <= B and 2 * cand * Dp * 2 <= budget // 2:
                tm = cand
                break
    else:
        tm = int(tile_m)
    B_pad = -(-B // tm) * tm                 # pad each half to a multiple of tm
    n_pad = 2 * B_pad                        # nb_rows = n_pad/tm >= 2 always
    if tile_n is None:
        tn = 128
        row_buf = 2 * tm * Dp * 2
        for cand in (1024, 512, 256):
            if n_pad % cand == 0 and row_buf + 2 * Dp * cand * 2 <= budget:
                tn = cand
                break
    else:
        tn = int(tile_n)
    return tm, tn, B_pad, n_pad


def contrast_loss(x_i: jax.Array, x_j: jax.Array,
                  temperature: float = 0.5, *,
                  tile_m=None, tile_n=None) -> jax.Array:
    assert x_i.shape == x_j.shape and x_i.ndim == 2
    B, D = x_i.shape
    inv_t = float(1.0 / temperature)
    eps = 1e-12                                  # matches F.normalize eps

    Dp = max(128, ((D + 127) // 128) * 128)      # lane / MXU-K alignment
    tm, tn, B_pad, n_pad = _choose_tiles(B, Dp, tile_m, tile_n)

    # --- one-time O(n*Dp) preprocessing in the wrapper ---------------------
    def _norm(x):
        x = x.astype(jnp.float32)
        return x * jax.lax.rsqrt(
            jnp.maximum(jnp.sum(x * x, axis=1, keepdims=True),
                        jnp.float32(eps * eps)))

    zi = _norm(x_i)                              # (B, D) f32, unit rows
    zj = _norm(x_j)

    # Positive term in full f32 precision (identical for (i,j) and (j,i)).
    pos = jnp.sum(zi * zj, axis=1)               # (B,)

    def _pad(z):
        return jnp.pad(z, ((0, B_pad - B), (0, Dp - D)))

    z = jnp.concatenate([_pad(zi), _pad(zj)], axis=0).astype(jnp.bfloat16)
    z_cols = z.T                                  # (Dp, n_pad) bf16, pre-transposed

    nb_rows = n_pad // tm
    nb_cols = n_pad // tn

    kernel = functools.partial(_denom_kernel, inv_t=inv_t, tm=tm, tn=tn,
                               half_valid=B, half_pad=B_pad)

    # Explicit VMEM budget: double-buffered row + col tiles + output block,
    # plus headroom for the [tm, tn] f32 intermediates / compiler scratch.
    vmem_limit = 2 * tm * Dp * 2 + 2 * Dp * tn * 2 + 2 * tm * 128 * 4 + (16 << 20)
    vmem_limit = int(min(vmem_limit, 100 << 20))

    out = pl.pallas_call(
        kernel,
        out_shape=jax.ShapeDtypeStruct((n_pad, 128), jnp.float32),
        grid_spec=pltpu.PrefetchScalarGridSpec(
            num_scalar_prefetch=0,
            grid=(nb_rows, nb_cols),
            in_specs=[
                # row block (bf16, fetched once per row block)
                pl.BlockSpec((tm, Dp), lambda i, k: (i, 0)),
                # column block, pre-transposed (bf16, dominant stream)
                pl.BlockSpec((Dp, tn), lambda i, k: (0, k)),
            ],
            # lane-dense per-row-block accumulator, resident across k
            out_specs=pl.BlockSpec((tm, 128), lambda i, k: (i, 0)),
        ),
        compiler_params=pltpu.CompilerParams(
            dimension_semantics=("parallel", "arbitrary"),
            vmem_limit_bytes=vmem_limit),
    )(z, z_cols)

    # Final 128-lane reduce + loss assembly (cheap, wrapper side).
    denom = jnp.sum(out, axis=1)                  # (n_pad,)
    denom_i = denom[:B]
    denom_j = denom[B_pad:B_pad + B]
    loss_sum = (jnp.sum(jnp.log(denom_i)) + jnp.sum(jnp.log(denom_j))
                - 2.0 * inv_t * jnp.sum(pos))
    return loss_sum / jnp.float32(2 * B)


def _reference_loss(x_i, x_j, temperature=0.5):
    # Pure-JAX f32 reference mirroring the PyTorch forward (validation only).
    eps = 1e-12
    zi = x_i / jnp.maximum(jnp.linalg.norm(x_i, axis=1, keepdims=True), eps)
    zj = x_j / jnp.maximum(jnp.linalg.norm(x_j, axis=1, keepdims=True), eps)
    z = jnp.concatenate([zi, zj], axis=0)
    sim = z @ z.T
    B = x_i.shape[0]
    sim_ij = jnp.diagonal(sim, offset=B)
    sim_ji = jnp.diagonal(sim, offset=-B)
    pos = jnp.concatenate([sim_ij, sim_ji], axis=0)
    nom = jnp.exp(pos / temperature)
    neg_mask = 1.0 - jnp.eye(2 * B, dtype=jnp.float32)
    denom = jnp.sum(neg_mask * jnp.exp(sim / temperature), axis=1)
    return jnp.sum(-jnp.log(nom / denom)) / (2 * B)


if __name__ == "__main__":
    key = jax.random.PRNGKey(0)
    k1, k2, k3, k4, k5, k6 = jax.random.split(key, 6)

    temperature = 0.5  # matches Contrast.__init__ default

    # Case 1: tiny batch (B=8, D=32) -> heavy row/feature padding, single
    # column block, padded-column masking path exercised.
    x_i = jax.random.normal(k1, (8, 32), dtype=jnp.float32)
    x_j = jax.random.normal(k2, (8, 32), dtype=jnp.float32)
    loss = jax.block_until_ready(contrast_loss(x_i, x_j, temperature))
    ref = _reference_loss(x_i, x_j, temperature)
    assert jnp.allclose(loss, ref, atol=2e-2, rtol=2e-2), (loss, ref)

    # Case 2: B=96, D=40 with small tile overrides -> two column blocks
    # (k-reduction / accumulator path) + padding mask + diagonal gating.
    y_i = jax.random.normal(k3, (96, 40), dtype=jnp.float32)
    y_j = jax.random.normal(k4, (96, 40), dtype=jnp.float32)
    loss2 = jax.block_until_ready(
        contrast_loss(y_i, y_j, temperature, tile_m=128, tile_n=128))
    ref2 = _reference_loss(y_i, y_j, temperature)
    assert jnp.allclose(loss2, ref2, atol=2e-2, rtol=2e-2), (loss2, ref2)

    # Case 3: B=128, D=256 -> no row padding (static no-pad branch),
    # default tile selection.
    w_i = jax.random.normal(k5, (128, 256), dtype=jnp.float32)
    w_j = jax.random.normal(k6, (128, 256), dtype=jnp.float32)
    loss3 = jax.block_until_ready(contrast_loss(w_i, w_j, temperature))
    ref3 = _reference_loss(w_i, w_j, temperature)
    assert jnp.allclose(loss3, ref3, atol=2e-2, rtol=2e-2), (loss3, ref3)

    print("KERNEL_OK")
</pallas_src>

<mosaic_0001>
module attributes {stable_mosaic.version = 11 : i64} {
  func.func @_denom_kernel(%arg0: i32, %arg1: i32, %arg2: memref<128x128xbf16, #tpu.memory_space<vmem>>, %arg3: memref<128x256xbf16, #tpu.memory_space<vmem>>, %arg4: memref<128x128xf32, #tpu.memory_space<vmem>>) attributes {dimension_semantics = [#tpu.dimension_semantics<parallel>, #tpu.dimension_semantics<arbitrary>], iteration_bounds = array<i64: 2, 1>, scalar_prefetch = 0 : i64, scratch_operands = 0 : i64, tpu.core_type = #tpu.core_type<tc>, window_params = [{transform_indices = @transform_0, window_bounds = array<i64: 128, 128>}, {transform_indices = @transform_1, window_bounds = array<i64: 128, 256>}, {transform_indices = @transform_2, window_bounds = array<i64: 128, 128>}]} {
    %c0_i32 = arith.constant 0 : i32
    %0 = arith.cmpi eq, %arg1, %c0_i32 : i32
    %1 = arith.extui %0 : i1 to i32
    %c0_i32_0 = arith.constant 0 : i32
    %2 = arith.cmpi ne, %1, %c0_i32_0 : i32
    scf.if %2 {
      %cst_12 = arith.constant 0.000000e+00 : f32
      %29 = vector.broadcast %cst_12 : f32 to vector<128x128xf32>
      %c0_13 = arith.constant 0 : index
      %c0_14 = arith.constant 0 : index
      %30 = vector.load %arg4[%c0_13, %c0_14] : memref<128x128xf32, #tpu.memory_space<vmem>>, vector<128x128xf32>
      tpu.vector_store %arg4[%c0_13, %c0_14], %29 {strides = array<i32>} : memref<128x128xf32, #tpu.memory_space<vmem>>, vector<128x128xf32>,
    } else {
    }
    %c0 = arith.constant 0 : index
    %c0_1 = arith.constant 0 : index
    %3 = vector.load %arg2[%c0, %c0_1] : memref<128x128xbf16, #tpu.memory_space<vmem>>, vector<128x128xbf16>
    %c0_2 = arith.constant 0 : index
    %c0_3 = arith.constant 0 : index
    %4 = vector.load %arg3[%c0_2, %c0_3] : memref<128x256xbf16, #tpu.memory_space<vmem>>, vector<128x256xbf16>
    %cst = arith.constant dense<0.000000e+00> : vector<128x256xf32>
    %5 = tpu.matmul %3, %4, %cst {dimension_numbers = #tpu.dot_dimension_numbers<[1], [0], [0], [1], [0, 0, 1, 1], [], []>} : vector<128x128xbf16>, vector<128x256xbf16>, vector<128x256xf32> -> vector<128x256xf32>
    %cst_4 = arith.constant 2.000000e+00 : f32
    %6 = vector.broadcast %cst_4 : f32 to vector<128x256xf32>
    %7 = arith.mulf %5, %6 : vector<128x256xf32>
    %8 = math.exp %7 : vector<128x256xf32>
    %c128_i32 = arith.constant 128 : i32
    %9 = arith.muli %arg0, %c128_i32 : i32
    %c256_i32 = arith.constant 256 : i32
    %10 = arith.muli %arg1, %c256_i32 : i32
    %c256_i32_5 = arith.constant 256 : i32
    %11 = arith.addi %10, %c256_i32_5 : i32
    %12 = arith.cmpi slt, %9, %11 : i32
    %c128_i32_6 = arith.constant 128 : i32
    %13 = arith.addi %9, %c128_i32_6 : i32
    %14 = arith.cmpi slt, %10, %13 : i32
    %15 = arith.andi %12, %14 : i1
    %c128_i32_7 = arith.constant 128 : i32
    %16 = arith.cmpi slt, %10, %c128_i32_7 : i32
    %c256_i32_8 = arith.constant 256 : i32
    %17 = arith.addi %10, %c256_i32_8 : i32
    %c8_i32 = arith.constant 8 : i32
    %18 = arith.cmpi sgt, %17, %c8_i32 : i32
    %19 = arith.andi %16, %18 : i1
    %c256_i32_9 = arith.constant 256 : i32
    %20 = arith.addi %10, %c256_i32_9 : i32
    %c136_i32 = arith.constant 136 : i32
    %21 = arith.cmpi sgt, %20, %c136_i32 : i32
    %22 = arith.ori %19, %21 : i1
    %23 = arith.ori %15, %22 : i1
    %24 = arith.extui %23 : i1 to i32
    %c0_i32_10 = arith.constant 0 : i32
    %25 = arith.cmpi ne, %24, %c0_i32_10 : i32
    scf.if %25 {
      %29 = tpu.iota {dimensions = array<i32: 0>} : vector<128x256xi32>
      %30 = vector.broadcast %9 : i32 to vector<128x256xi32>
      %31 = arith.addi %30, %29 : vector<128x256xi32>
      %32 = tpu.iota {dimensions = array<i32: 1>} : vector<128x256xi32>
      %33 = vector.broadcast %10 : i32 to vector<128x256xi32>
      %34 = arith.addi %33, %32 : vector<128x256xi32>
      %35 = arith.cmpi eq, %31, %34 : vector<128x256xi32>
      %c8_i32_12 = arith.constant 8 : i32
      %36 = vector.broadcast %c8_i32_12 : i32 to vector<128x256xi32>
      %37 = arith.cmpi sge, %34, %36 : vector<128x256xi32>
      %c128_i32_13 = arith.constant 128 : i32
      %38 = vector.broadcast %c128_i32_13 : i32 to vector<128x256xi32>
      %39 = arith.cmpi slt, %34, %38 : vector<128x256xi32>
      %40 = arith.andi %37, %39 : vector<128x256xi1>
      %c136_i32_14 = arith.constant 136 : i32
      %41 = vector.broadcast %c136_i32_14 : i32 to vector<128x256xi32>
      %42 = arith.cmpi sge, %34, %41 : vector<128x256xi32>
      %43 = arith.ori %40, %42 : vector<128x256xi1>
      %44 = arith.ori %35, %43 : vector<128x256xi1>
      %c0_15 = arith.constant 0 : index
      %c0_16 = arith.constant 0 : index
      %45 = vector.load %arg4[%c0_15, %c0_16] : memref<128x128xf32, #tpu.memory_space<vmem>>, vector<128x128xf32>
      %cst_17 = arith.constant 0.000000e+00 : f32
      %46 = vector.broadcast %cst_17 : f32 to vector<128x256xf32>
      %47 = arith.select %44, %46, %8 : vector<128x256xi1>, vector<128x256xf32>
      %48 = vector.extract_strided_slice %47 {offsets = [0, 0], sizes = [128, 128], strides = [1, 1]} : vector<128x256xf32> to vector<128x128xf32>
      %49 = vector.extract_strided_slice %47 {offsets = [0, 128], sizes = [128, 128], strides = [1, 1]} : vector<128x256xf32> to vector<128x128xf32>
      %50 = arith.addf %48, %49 : vector<128x128xf32>
      %51 = arith.addf %45, %50 : vector<128x128xf32>
      %c0_18 = arith.constant 0 : index
      %c0_19 = arith.constant 0 : index
      %52 = vector.load %arg4[%c0_18, %c0_19] : memref<128x128xf32, #tpu.memory_space<vmem>>, vector<128x128xf32>
      tpu.vector_store %arg4[%c0_18, %c0_19], %51 {strides = array<i32>} : memref<128x128xf32, #tpu.memory_space<vmem>>, vector<128x128xf32>,
    } else {
    }
    %true = arith.constant true
    %26 = arith.xori %23, %true : i1
    %27 = arith.extui %26 : i1 to i32
    %c0_i32_11 = arith.constant 0 : i32
    %28 = arith.cmpi ne, %27, %c0_i32_11 : i32
    scf.if %28 {
      %c0_12 = arith.constant 0 : index
      %c0_13 = arith.constant 0 : index
      %29 = vector.load %arg4[%c0_12, %c0_13] : memref<128x128xf32, #tpu.memory_space<vmem>>, vector<128x128xf32>
      %30 = vector.extract_strided_slice %8 {offsets = [0, 0], sizes = [128, 128], strides = [1, 1]} : vector<128x256xf32> to vector<128x128xf32>
      %31 = vector.extract_strided_slice %8 {offsets = [0, 128], sizes = [128, 128], strides = [1, 1]} : vector<128x256xf32> to vector<128x128xf32>
      %32 = arith.addf %30, %31 : vector<128x128xf32>
      %33 = arith.addf %29, %32 : vector<128x128xf32>
      %c0_14 = arith.constant 0 : index
      %c0_15 = arith.constant 0 : index
      %34 = vector.load %arg4[%c0_14, %c0_15] : memref<128x128xf32, #tpu.memory_space<vmem>>, vector<128x128xf32>
      tpu.vector_store %arg4[%c0_14, %c0_15], %33 {strides = array<i32>} : memref<128x128xf32, #tpu.memory_space<vmem>>, vector<128x128xf32>,
    } else {
    }
    return
  }
  func.func @transform_0(%arg0: i32, %arg1: i32) -> (i32, i32) {
    %c0_i32 = arith.constant 0 : i32
    %c0_i32_0 = arith.constant 0 : i32
    return %arg0, %c0_i32 : i32, i32
  }
  func.func @transform_1(%arg0: i32, %arg1: i32) -> (i32, i32) {
    %c0_i32 = arith.constant 0 : i32
    %c0_i32_0 = arith.constant 0 : i32
    return %c0_i32, %arg1 : i32, i32
  }
  func.func @transform_2(%arg0: i32, %arg1: i32) -> (i32, i32) {
    %c0_i32 = arith.constant 0 : i32
    %c0_i32_0 = arith.constant 0 : i32
    return %arg0, %c0_i32 : i32, i32
  }
}

</mosaic_0001>

<bundles_post_ra>
// kernel: tpu_custom_call.1
= control target key start
LH: loop header
LB: loop body
LE: loop exit
PB: predicated region body
PF: predicated region fallthrough
CT: control target
= control target key end

     0   :  { %7 = vsyncpa [#allocation3], 0  ;;  %s2111_s0 = inlined_call_operand.hbm [shape: bf16[256,128], index: 0, kind: input, shape index: {}]   ;;  %s2112_s1 = inlined_call_operand.hbm [shape: bf16[128,256], index: 1, kind: input, shape index: {}]   ;;  %s2113_s2 = inlined_call_operand.hbm [shape: f32[256,128], index: 2, kind: output, shape index: {}]  }
   0x1   :  { %9 = vsyncpa [#allocation3 + $0x1], 0 }
   0x2   :  { %10 = vsyncpa [#allocation6], 0 }
   0x3   :  { %11 = vsyncpa [#allocation4], 0 }
   0x4   :  { %13 = vsyncpa [#allocation4 + $0x1], 0  ;;  %s1401_s9 = smov 0   ;;  %s1403_s10 = smov 0  }
   0x5   :  { %s1405_s11 = smov 0   ;;  %s1407_s12 = smov 0  }
   0x6   :  { %s1409_s13 = smov 0   ;;  %s1411_s14 = smov 0  }
   0x7 LB: > { %s992_s15 = sadd.s32 4294967295, %s1374_s14   ;;  %s993_s16 = sadd.s32 4294967294, %s1374_s14   ;;  %s1374_s14 = sphi %s1411_s14, %s19_s14   ;;  %s1370_s13 = sphi %s1409_s13, %s2195_s13   ;;  %s1366_s12 = sphi %s1407_s12, %s2194_s12   ;;  %s1362_s11 = sphi %s1405_s11, %s2193_s11   ;;  %s1358_s10 = sphi %s1403_s10, %s2192_s10   ;;  %s1354_s9 = sphi %s1401_s9, %s2191_s9  }
   0x8   : > { %p51_p0 = scmp.ne.s32.totalorder %s1358_s10, %s1354_s9  ;;  %p1435_p1 = scmp.eq.s32.totalorder %s992_s15, 0 }
   0x9   : > { %p1439_p2 = scmp.eq.s32.totalorder %s992_s15, 1  ;;  %p107_p3 = scmp.eq.s32.totalorder %s993_s16, 1 }
   0xa   : > { %s2118_s17 = scalar_select %p1435_p1, 1, 0 }
   0xb   : > { %s2119_s18 = scalar_select %p1439_p2, 1, 0 }
   0xc   : > { %p1445_p4 = por %p1435_p1, %p51_p0  ;;  %p994_p5 = scmp.ge.s32.totalorder %s1374_s14, 1 }
   0xd   : > { %p1450_p6 = por %p107_p3, %p51_p0  ;;  %p114_p7 = scmp.lt.s32.totalorder %s1374_s14, 3 }
   0xe   : > { %s2120_s19 = scalar_select %p1445_p4, 1, 0 }
   0xf   : > { %s2121_s20 = scalar_select %p1450_p6, 1, 0 }
  0x10   : > { %p1455_p8 = pnand %p994_p5, %p114_p7  ;;  %s1376_s22 = smov [#allocation5]  }
  0x11   : > { %s129_s23 = sshll.u32 %s1376_s22, 4  ;;  %s31_s25 = sadd.s32 1, %s1370_s13  ;;  %s130_s23 = int_to_ptr.vmem [resolvable:$true] %s129_s23 }
  0x12   : > { %s2122_s21 = scalar_select %p1455_p8, 1, 0 }
  0x13   : > { %p1061_p9 = pneg %p1455_p8  ;;  %s1230_s28 = scalar_lea.hbm %s2112_s1, 2048 }
  0x14   : > { %p1231_p12 = scmp.ne.s32.totalorder %s2112_s1, %s1230_s28  ;;  %p1237_p5 = scmp.lt.u32.totalorder %s1230_s28, %s2112_s1 }
  0x15   : > { %p1464_p11 = pnand %p1061_p9, %p1435_p1 }
  0x17   : > { %p1232_p13 = pneg %p1464_p11 }
  0x19   : > { %p1233_p0 = pnand %p1232_p13, %p1231_p12 }
  0x1b   : > { %p1234_p3 = pneg %p1233_p0 }
  0x1d   : > { %p1239_p7 = pnand %p1237_p5, %p1234_p3 }
  0x1f   : > { %1242 = shalt.err (!%p1239_p7)
}
  0x20   : > { %s1243_s5 = scalar_lea.vmem %s130_s23, 2048  ;;  %p1251_p1 = scmp.lt.s32.totalorder %s130_s23, %s130_s23 }
  0x21   : > { %p1244_p9 = scmp.ne.s32.totalorder %s130_s23, %s1243_s5  ;;  %p1252_p4 = scmp.lt.s32.totalorder %s1243_s5, %s1243_s5 }
  0x23   : > { %p1246_p10 = pnand %p1244_p9, %p1232_p13  ;;  %p1253_p8 = por %p1252_p4, %p1251_p1 }
  0x25   : > { %p1247_p6 = pneg %p1246_p10 }
  0x27   : > { %p1254_p2 = pnand %p1253_p8, %p1247_p6 }
  0x29   : > { %1257 = shalt.err (!%p1254_p2)
}
  0x2a   : > { %s1377_s6 = smov 128   ;;  %s1378_s7 = smov 8  }
  0x2b   : > { %1064 = dma.hbm_to_vmem [thread:$0]  (!%p1464_p11), %s2112_s1, 2048, %s130_s23, [#allocation6], %s1377_s6, %s1377_s6, %s1378_s7  }
  0x2c   : > { %p33_p1 = scmp.ge.s32.totalorder %s31_s25, 2  ;;  %s38_s16 = sadd.s32 1, %s1362_s11 }
  0x2d   : > { %p45_p2 = scmp.ne.s32.totalorder %s1362_s11, %s1358_s10  ;;  %p46_p4 = scmp.eq.s32.totalorder %s1374_s14, 0 }
  0x2e   : > { %s2197_s25 = smov (%p33_p1, %s31_s25), 0  ;;  %p2125_p8 = scmp.ne.s32.totalorder %s2119_s18, 0 }
  0x2f   : > { %p1491_p6 = por %p46_p4, %p45_p2  ;;  %s35_s24 = ssub.s32 %s1370_s13, %s2197_s25 }
  0x30   : > { %p1497_p10 = por %p2125_p8, %p45_p2  ;;  %p1074_p12 = scmp.lt.s32.totalorder %s1374_s14, 2 }
  0x31   : > { %p36_p11 = scmp.eq.s32.totalorder %s35_s24, 0  ;;  %s143_s23 = sand.u32 1, %s1362_s11  }
  0x32   : > { %s997_s27 = sshll.u32 %s143_s23, 6  ;;  %s1035_s29 = sshll.u32 %s1370_s13, 10 }
  0x33   : > { %s1506_s28 = scalar_select %p36_p11, %s1362_s11, %s38_s16  }
  0x34   : > { %s1512_s4 = scalar_lea.hbm %s2111_s0, %s1035_s29  ;;  %s147_s18 = scalar_lea.vmem [#allocation2], %s997_s27 }
  0x35   : > { %s154_s5 = sshll.u32 %s147_s18, 4  ;;  %p1518_p13 = pnand %p1074_p12, %p1491_p6  ;;  %s1514_s5 = int_to_ptr.vmem [resolvable:$true] %s154_s5 }
  0x36   : > { %s1522_s7 = scalar_lea.sflag [#allocation3], %s143_s23  ;;  %s1258_s8 = scalar_lea.hbm %s1512_s4, 1024 }
  0x37   : > { %p1259_p0 = scmp.ne.s32.totalorder %s1512_s4, %s1258_s8  ;;  %p1260_p3 = pneg %p1518_p13 }
  0x38   : > { %s1263_s22 = scalar_lea.hbm %s2111_s0, 2048  ;;  %p1264_p9 = scmp.lt.u32.totalorder %s1512_s4, %s2111_s0 }
  0x39   : > { %p1261_p5 = pnand %p1260_p3, %p1259_p0  ;;  %p1265_p1 = scmp.lt.u32.totalorder %s1263_s22, %s1258_s8 }
  0x3a   : > { %p1267_p4 = scmp.lt.u32.totalorder %s1258_s8, %s1512_s4 }
  0x3b   : > { %p1262_p7 = pneg %p1261_p5  ;;  %p1266_p2 = por %p1265_p1, %p1264_p9 }
  0x3d   : > { %p1268_p6 = por %p1267_p4, %p1266_p2 }
  0x3f   : > { %p1269_p8 = pnand %p1268_p6, %p1262_p7 }
  0x41   : > { %1272 = shalt.err (!%p1269_p8)
}
  0x42   : > { %s1273_s23 = scalar_lea.vmem %s1514_s5, 1024  ;;  %s1379_s29 = smov [#allocation2]  }
  0x43   : > { %p1274_p12 = scmp.ne.s32.totalorder %s1514_s5, %s1273_s23  ;;  %s1278_s30 = sshll.u32 %s1379_s29, 4  ;;  %s1279_s30 = int_to_ptr.vmem [resolvable:$false] %s1278_s30 }
  0x44   : > { %s1280_s3 = scalar_lea.vmem %s1279_s30, 2048  ;;  %p1281_p5 = scmp.lt.s32.totalorder %s1514_s5, %s1279_s30 }
  0x45   : > { %p1276_p11 = pnand %p1274_p12, %p1260_p3  ;;  %p1282_p9 = scmp.lt.s32.totalorder %s1280_s3, %s1273_s23 }
  0x47   : > { %p1277_p0 = pneg %p1276_p11  ;;  %p1283_p1 = por %p1282_p9, %p1281_p5 }
  0x49   : > { %p1284_p2 = pnand %p1283_p1, %p1277_p0 }
  0x4b   : > { %1287 = shalt.err (!%p1284_p2)
}
  0x4c   : > { %s1380_s18 = smov 64   ;;  %s1381_s8 = smov 4  }
  0x4d   : > { %1068 = dma.hbm_to_vmem [thread:$0]  (!%p1518_p13), %s1512_s4, 1024, %s1514_s5, %s1522_s7, %s1380_s18, %s1380_s18, %s1381_s8  }
  0x4e   : > { %p2128_p3 = scmp.ne.s32.totalorder %s2122_s21, 0 }
  0x4f   : > { %s1553_s15 = sand.u32 (!%p2128_p3), 1, %s1358_s10   ;;  %p2129_p7 = scmp.ne.s32.totalorder (!%p2128_p3), %s2120_s19, 0 }
  0x50   : > { %166 = sbr.rel (%p2128_p3) target bundleno = 407 (0x197), region = 28  ;;  %s1001_s16 = sshll.u32 (!%p2128_p3), %s1553_s15, 6 }
  0x51   : > { %s169_s22 = scalar_lea.sflag (!%p2128_p3), [#allocation3], %s1553_s15  ;;  %s1557_s24 = scalar_lea.vmem (!%p2128_p3), [#allocation2], %s1001_s16 }
  0x57   : > { %1341 = dma.done.wait (%p2129_p7), %s169_s22, 1024  }
  0x58   : > { %1343 = vsyncadd (%p2129_p7), %s169_s22, 4294966272  ;;  %p2130_p13 = scmp.ne.s32.totalorder %s2118_s17, 0 }
  0x5a   : > { %1345 = dma.done.wait (%p2130_p13), [#allocation6], 2048  }
  0x5b   : > { %1347 = vsyncadd (%p2130_p13), [#allocation6], 4294965248  ;;  %v1382_v0 = vmov 0   ;;  %v1134_v1 = vld [vmem:[#allocation5 + $0x4] ss:$8 sps:$4 sm:$0xff]   ;;  %v1162_v21 = vld [vmem:[%s1557_s24 + $0x10] sm:$0xff]   ;;  %v608_v25 = vlaneseq }
  0x5c   : > { %413 = vmatprep.mubr.bf16.mxu0 %v1382_v0  ;;  %453 = vmatprep.mubr.bf16.mxu1 %v1382_v0  ;;  %v1136_v2 = vld [vmem:[#allocation5] ss:$8 sps:$4 sm:$0xff]   ;;  %v1137_v3 = vld [vmem:[#allocation5 + $0x14] ss:$8 sps:$4 sm:$0xff]   ;;  %v1139_v4 = vld [vmem:[#allocation5 + $0x10] ss:$8 sps:$4 sm:$0xff]  }
  0x5d   : > { %381 = vmatprep.subr.bf16.mxu0 %v1134_v1  ;;  %1037 = vmatprep.subr.bf16.mxu1 %v1134_v1  ;;  %v1140_v5 = vld [vmem:[#allocation5 + $0x24] ss:$8 sps:$4 sm:$0xff]   ;;  %v1142_v6 = vld [vmem:[#allocation5 + $0x20] ss:$8 sps:$4 sm:$0xff]   ;;  %v1143_v7 = vld [vmem:[#allocation5 + $0x34] ss:$8 sps:$4 sm:$0xff]  }
  0x5e   : > { %382 = vmatpush1.bf16.msra.mxu0 %v1136_v2  ;;  %1045 = vmatpush1.bf16.msra.mxu1 %v1136_v2  ;;  %v1145_v8 = vld [vmem:[#allocation5 + $0x30] ss:$8 sps:$4 sm:$0xff]   ;;  %v1146_v9 = vld [vmem:[#allocation5 + $0x44] ss:$8 sps:$4 sm:$0xff]   ;;  %v1148_v10 = vld [vmem:[#allocation5 + $0x40] ss:$8 sps:$4 sm:$0xff]  }
  0x5f   : > { %383 = vmatprep.subr.bf16.mxu0 %v1137_v3  ;;  %1038 = vmatprep.subr.bf16.mxu1 %v1137_v3  ;;  %v1149_v11 = vld [vmem:[#allocation5 + $0x54] ss:$8 sps:$4 sm:$0xff]   ;;  %v1151_v12 = vld [vmem:[#allocation5 + $0x50] ss:$8 sps:$4 sm:$0xff]   ;;  %v1152_v13 = vld [vmem:[#allocation5 + $0x64] ss:$8 sps:$4 sm:$0xff]  }
  0x60   : > { %v1154_v14 = vld [vmem:[#allocation5 + $0x60] ss:$8 sps:$4 sm:$0xff]   ;;  %v1155_v15 = vld [vmem:[#allocation5 + $0x74] ss:$8 sps:$4 sm:$0xff]   ;;  %v1157_v16 = vld [vmem:[#allocation5 + $0x70] ss:$8 sps:$4 sm:$0xff]  }
  0x61   : > { %v1158_v17 = vld [vmem:[%s1557_s24] sm:$0xff]   ;;  %v1160_v19 = vld [vmem:[%s1557_s24 + $0x8] sm:$0xff]   ;;  %v1163_v22 = vld [vmem:[%s1557_s24 + $0x30] sm:$0xff]   ;;  %v1583_v26 = vshrl.u32 %v608_v25, 7  ;;  %s1028_s17 = sshll.u32 %s1366_s12, 7  ;;  %v1588_v28 = vand.u32 127, %v608_v25 }
  0x62   : > { %384 = vmatpush1.bf16.msra.mxu0 %v1139_v4  ;;  %1046 = vmatpush1.bf16.msra.mxu1 %v1139_v4  ;;  %v1159_v18 = vld [vmem:[%s1557_s24 + $0x20] sm:$0xff]   ;;  %v1161_v20 = vld [vmem:[%s1557_s24 + $0x28] sm:$0xff]   ;;  %v1164_v23 = vld [vmem:[%s1557_s24 + $0x18] sm:$0xff]   ;;  %v1586_v27 = vstv %s1028_s17  ;;  %s1003_s19 = sshll.u32 %s1553_s15, 7  ;;  %s1036_s4 = sshll.u32 %s1366_s12, 11 }
  0x63   : > { %385 = vmatprep.subr.bf16.mxu0 %v1140_v5  ;;  %1039 = vmatprep.subr.bf16.mxu1 %v1140_v5  ;;  %v1165_v24 = vld [vmem:[%s1557_s24 + $0x38] sm:$0xff]   ;;  %v617_v29 = vadd.s32 64, %v1583_v26  ;;  %v610_v30 = vadd.s32 8, %v1583_v26  ;;  %v618_v31 = vadd.s32 72, %v1583_v26  ;;  %v1595_v32 = vadd.s32 %v1586_v27, %v1583_v26  ;;  %s1801_s21 = scalar_lea.vmem [#allocation7], %s1003_s19  ;;  %s2058_s27 = scalar_lea.hbm %s2113_s2, %s1036_s4 }
  0x64   : > { %v1601_v34 = vadd.s32 128, %v1588_v28  ;;  %v611_v39 = vadd.s32 16, %v1583_v26  ;;  %v619_v40 = vadd.s32 80, %v1583_v26  ;;  %v612_v45 = vadd.s32 24, %v1583_v26  ;;  %s899_s5 = sshll.u32 %s1801_s21, 4  ;;  %s886_s23 = scalar_lea.sflag [#allocation4], %s1553_s15  ;;  %s2060_s5 = int_to_ptr.vmem [resolvable:$true] %s899_s5 }
  0x65   : > { %v1598_v33 = vadd.s32 %v1586_v27, %v617_v29  ;;  %v1604_v35 = vadd.s32 %v1586_v27, %v610_v30  ;;  %v1607_v38 = vadd.s32 %v1586_v27, %v618_v31  ;;  %v620_v46 = vadd.s32 88, %v1583_v26  ;;  %s1288_s29 = scalar_lea.vmem %s2060_s5, 2048  ;;  %s1383_s12 = smov [#allocation7]  }
  0x66   : > { %386 = vmatpush1.bf16.msra.mxu0 %v1142_v6  ;;  %1047 = vmatpush1.bf16.msra.mxu1 %v1142_v6  ;;  %vm648_vm0 = vcmp.eq.s32.totalorder %v1595_v32, %v1588_v28  ;;  %vm680_vm1 = vcmp.ge.s32.totalorder %v1588_v28, 8  ;;  %v613_v51 = vadd.s32 32, %v1583_v26  ;;  %v621_v52 = vadd.s32 96, %v1583_v26  ;;  %p1289_p4 = scmp.ne.s32.totalorder %s2060_s5, %s1288_s29  ;;  %s1292_s30 = sshll.u32 %s1383_s12, 4  ;;  %s1293_s30 = int_to_ptr.vmem [resolvable:$false] %s1292_s30 }
  0x67   : > { %387 = vmatprep.subr.bf16.mxu0 %v1143_v7  ;;  %1040 = vmatprep.subr.bf16.mxu1 %v1143_v7  ;;  %vm664_vm2 = vcmp.eq.s32.totalorder %v1598_v33, %v1588_v28  ;;  %vm649_vm3 = vcmp.eq.s32.totalorder %v1595_v32, %v1601_v34  ;;  %vm687_vm4 = vcmp.ge.s32.totalorder %v1601_v34, 136  ;;  %v1624_v61 = vadd.s32 %v1586_v27, %v611_v39  ;;  %vm1666_vm13 = vmor %vm648_vm0, %vm680_vm1  ;;  %s1294_s3 = scalar_lea.vmem %s1293_s30, 4096  ;;  %p1295_p12 = scmp.lt.s32.totalorder %s2060_s5, %s1293_s30 }
  0x68   : > { %v1627_v62 = vadd.s32 %v1586_v27, %v619_v40  ;;  %vm665_vm5 = vcmp.eq.s32.totalorder %v1598_v33, %v1601_v34  ;;  %v1632_v1 = vadd.s32 %v1586_v27, %v612_v45  ;;  %vm650_vm6 = vcmp.eq.s32.totalorder %v1604_v35, %v1588_v28  ;;  %vm1677_vm15 = vmor %vm664_vm2, %vm680_vm1  ;;  %p1290_p6 = pnand %p1289_p4, %p1497_p10  ;;  %p1296_p11 = scmp.lt.s32.totalorder %s1294_s3, %s1288_s29 }
  0x69   : > { %v1637_v4 = vadd.s32 %v1586_v27, %v620_v46  ;;  %vm666_vm7 = vcmp.eq.s32.totalorder %v1607_v38, %v1588_v28  ;;  %v1642_v6 = vadd.s32 %v1586_v27, %v613_v51  ;;  %v1645_v7 = vadd.s32 %v1586_v27, %v621_v52  ;;  %vm1694_vm2 = vmor %vm649_vm3, %vm687_vm4 }
  0x6a   : > { %388 = vmatpush1.bf16.msra.mxu0 %v1145_v8  ;;  %1048 = vmatpush1.bf16.msra.mxu1 %v1145_v8  ;;  %vm651_vm8 = vcmp.eq.s32.totalorder %v1604_v35, %v1601_v34  ;;  %vm667_vm9 = vcmp.eq.s32.totalorder %v1607_v38, %v1601_v34  ;;  %vm652_vm10 = vcmp.eq.s32.totalorder %v1624_v61, %v1588_v28  ;;  %vm1713_vm3 = vmor %vm665_vm5, %vm687_vm4  ;;  %p1291_p8 = pneg %p1290_p6  ;;  %p1297_p0 = por %p1296_p11, %p1295_p12 }
  0x6b   : > { %389 = vmatprep.subr.bf16.mxu0 %v1146_v9  ;;  %1041 = vmatprep.subr.bf16.mxu1 %v1146_v9  ;;  %vm668_vm11 = vcmp.eq.s32.totalorder %v1627_v62, %v1588_v28  ;;  %vm653_vm12 = vcmp.eq.s32.totalorder %v1624_v61, %v1601_v34  ;;  %vm669_vm14 = vcmp.eq.s32.totalorder %v1627_v62, %v1601_v34  ;;  %vm1730_vm5 = vmor %vm650_vm6, %vm680_vm1 }
  0x6c   : > { %vm655_vm0 = vcmp.eq.s32.totalorder %v1632_v1, %v1601_v34  ;;  %vm1743_vm6 = vmor %vm666_vm7, %vm680_vm1  ;;  %p1298_p5 = pnand %p1297_p0, %p1291_p8 }
  0x6d   : > { %vm1756_vm7 = vmor %vm651_vm8, %vm687_vm4 }
  0x6e   : > { %390 = vmatpush1.bf16.msra.mxu0 %v1148_v10  ;;  %1049 = vmatpush1.bf16.msra.mxu1 %v1148_v10  ;;  %vm1769_vm8 = vmor %vm667_vm9, %vm687_vm4  ;;  %vm673_vm9 = vcmp.eq.s32.totalorder %v1645_v7, %v1601_v34 }
  0x6f   : > { %391 = vmatprep.subr.bf16.mxu0 %v1149_v11  ;;  %1042 = vmatprep.subr.bf16.mxu1 %v1149_v11  ;;  %v614_v11 = vadd.s32 40, %v1583_v26 }
  0x71   : > { %v1684_v45 = vadd.s32 %v1586_v27, %v614_v11 }
  0x72   : > { %392 = vmatpush1.bf16.msra.mxu0 %v1151_v12  ;;  %1050 = vmatpush1.bf16.msra.mxu1 %v1151_v12  ;;  %v622_v12 = vadd.s32 104, %v1583_v26 }
  0x73   : > { %393 = vmatprep.subr.bf16.mxu0 %v1152_v13  ;;  %1043 = vmatprep.subr.bf16.mxu1 %v1152_v13 }
  0x74   : > { %v1687_v46 = vadd.s32 %v1586_v27, %v622_v12 }
  0x76   : > { %394 = vmatpush1.bf16.msra.mxu0 %v1154_v14  ;;  %1051 = vmatpush1.bf16.msra.mxu1 %v1154_v14 }
  0x77   : > { %395 = vmatprep.subr.bf16.mxu0 %v1155_v15  ;;  %1044 = vmatprep.subr.bf16.mxu1 %v1155_v15 }
  0x7a   : > { %396 = vmatpush1.bf16.msra.mxu0 %v1157_v16  ;;  %1052 = vmatpush1.bf16.msra.mxu1 %v1157_v16 }
  0x7d   : > { %414 = vmatmul.mubr.bf16.vlgmr.msra.gmra.mrb[0].mxu0 %v1158_v17  ;;  %454 = vmatmul.mubr.bf16.vlgmr.msra.gmra.mrb[0].mxu1 %v1159_v18  ;;  %v615_v17 = vadd.s32 48, %v1583_v26 }
  0x7e   : > { %423 = vmatprep.mubr.bf16.mxu0 %v1382_v0  ;;  %463 = vmatprep.mubr.bf16.mxu1 %v1382_v0 }
  0x85   : > { %424 = vmatmul.mubr.bf16.gmra.mrb[4].mxu0 %v1160_v19  ;;  %464 = vmatmul.mubr.bf16.gmra.mrb[4].mxu1 %v1161_v20 }
  0x86   : > { %433 = vmatprep.mubr.bf16.mxu0 %v1382_v0  ;;  %473 = vmatprep.mubr.bf16.mxu1 %v1382_v0 }
  0x8d   : > { %434 = vmatmul.mubr.bf16.gmra.mrb[8].mxu0 %v1162_v21  ;;  %474 = vmatmul.mubr.bf16.gmra.mrb[8].mxu1 %v1163_v22  ;;  %v623_v22 = vadd.s32 112, %v1583_v26 }
  0x8e   : > { %443 = vmatprep.mubr.bf16.mxu0 %v1382_v0  ;;  %483 = vmatprep.mubr.bf16.mxu1 %v1382_v0 }
  0x8f   : > { %v1704_v51 = vadd.s32 %v1586_v27, %v623_v22 }
  0x95   : > { %444 = vmatmul.mubr.bf16.gmra.mrb[12].mxu0 %v1164_v23  ;;  %484 = vmatmul.mubr.bf16.gmra.mrb[12].mxu1 %v1165_v24 }
 0x150   : > { %v415_v36 = vpop.f32.mrb[0].mxu0  ;;  %v455_v37 = vpop.f32.mrb[0].mxu1 }
 0x151   : > { %v494_v41 = vmul.f32 2.0, %v415_v36  ;;  %v510_v42 = vmul.f32 2.0, %v455_v37  ;;  %v417_v43 = vpop.f32.mrb[1].mxu0  ;;  %v457_v44 = vpop.f32.mrb[1].mxu1 }
 0x152   : > { %v495_v47 = vmul.f32 2.0, %v417_v43  ;;  %v511_v48 = vmul.f32 2.0, %v457_v44  ;;  %v419_v49 = vpop.f32.mrb[2].mxu0  ;;  %v459_v50 = vpop.f32.mrb[2].mxu1 }
 0x153   : > { %v526_v53 = vmul.f32 1.442695, %v494_v41  ;;  %v558_v54 = vmul.f32 1.442695, %v510_v42  ;;  %v496_v55 = vmul.f32 2.0, %v419_v49  ;;  %v512_v56 = vmul.f32 2.0, %v459_v50 }
 0x154   : > { %v528_v57 = vmul.f32 1.442695, %v495_v47  ;;  %v560_v58 = vmul.f32 1.442695, %v511_v48  ;;  %v421_v59 = vpop.f32.mrb[3].mxu0  ;;  %v461_v60 = vpop.f32.mrb[3].mxu1  ;;  %v1701_v50 = vadd.s32 %v1586_v27, %v615_v17 }
 0x155   : > { %1166 = vpow2.f32 %v526_v53  ;;  %v530_v63 = vmul.f32 1.442695, %v496_v55  ;;  %v497_v0 = vmul.f32 2.0, %v421_v59  ;;  %v562_v2 = vmul.f32 1.442695, %v512_v56 }
 0x156   : > { %1168 = vpow2.f32 %v558_v54  ;;  %v513_v3 = vmul.f32 2.0, %v461_v60 }
 0x157   : > { %1170 = vpow2.f32 %v528_v57  ;;  %v532_v5 = vmul.f32 1.442695, %v497_v0  ;;  %v1720_v57 = vadd.s32 56, %v1583_v26 }
 0x158   : > { %1172 = vpow2.f32 %v560_v58  ;;  %v564_v8 = vmul.f32 1.442695, %v513_v3  ;;  %v425_v9 = vpop.f32.mrb[4].mxu0  ;;  %v465_v10 = vpop.f32.mrb[4].mxu1 }
 0x159   : > { %1174 = vpow2.f32 %v530_v63  ;;  %v498_v13 = vmul.f32 2.0, %v425_v9  ;;  %v514_v14 = vmul.f32 2.0, %v465_v10  ;;  %v427_v15 = vpop.f32.mrb[5].mxu0  ;;  %v467_v16 = vpop.f32.mrb[5].mxu1 }
 0x15a   : > { %1176 = vpow2.f32 %v562_v2  ;;  %v499_v18 = vmul.f32 2.0, %v427_v15  ;;  %v515_v19 = vmul.f32 2.0, %v467_v16  ;;  %v429_v20 = vpop.f32.mrb[6].mxu0  ;;  %v469_v21 = vpop.f32.mrb[6].mxu1 }
 0x15b   : > { %1178 = vpow2.f32 %v532_v5  ;;  %v534_v23 = vmul.f32 1.442695, %v498_v13  ;;  %v566_v24 = vmul.f32 1.442695, %v514_v14  ;;  %v500_v25 = vmul.f32 2.0, %v429_v20  ;;  %v431_v29 = vpop.f32.mrb[7].mxu0 }
 0x15c   : > { %1180 = vpow2.f32 %v564_v8  ;;  %v536_v30 = vmul.f32 1.442695, %v499_v18  ;;  %v568_v31 = vmul.f32 1.442695, %v515_v19  ;;  %v516_v36 = vmul.f32 2.0, %v469_v21  ;;  %v471_v37 = vpop.f32.mrb[7].mxu1 }
 0x15d   : > { %1182 = vpow2.f32 %v534_v23  ;;  %v538_v40 = vmul.f32 1.442695, %v500_v25  ;;  %v501_v41 = vmul.f32 2.0, %v431_v29  ;;  %v517_v42 = vmul.f32 2.0, %v471_v37 }
 0x15e   : > { %1184 = vpow2.f32 %v566_v24  ;;  %v570_v44 = vmul.f32 1.442695, %v516_v36 }
 0x15f   : > { %v1167_v47 = vpop.eup %1166  ;;  %1186 = vpow2.f32 %v536_v30  ;;  %v540_v49 = vmul.f32 1.442695, %v501_v41  ;;  %v572_v54 = vmul.f32 1.442695, %v517_v42 }
 0x160   : > { %v1169_v52 = vpop.eup %1168  ;;  %v738_v32 = vsel %vm1666_vm13, 0.0, %v1167_v47  ;;  %1188 = vpow2.f32 %v568_v31  ;;  %v435_v55 = vpop.f32.mrb[8].mxu0  ;;  %vm671_vm13 = vcmp.eq.s32.totalorder %v1637_v4, %v1601_v34 }
 0x161   : > { %v475_v56 = vpop.f32.mrb[8].mxu1  ;;  %v1171_v58 = vpop.eup %1170  ;;  %v754_v59 = vsel %vm1677_vm15, 0.0, %v1169_v52  ;;  %1190 = vpow2.f32 %v538_v40  ;;  %v502_v60 = vmul.f32 2.0, %v435_v55  ;;  %vm656_vm15 = vcmp.eq.s32.totalorder %v1642_v6, %v1588_v28 }
 0x162   : > { %v518_v63 = vmul.f32 2.0, %v475_v56  ;;  %v437_v0 = vpop.f32.mrb[9].mxu0  ;;  %v477_v2 = vpop.f32.mrb[9].mxu1  ;;  %v739_v5 = vsel %vm1694_vm2, 0.0, %v1171_v58  ;;  %1192 = vpow2.f32 %v570_v44  ;;  %vm672_vm2 = vcmp.eq.s32.totalorder %v1645_v7, %v1588_v28 }
 0x163   : > { %v1173_v3 = vpop.eup %1172  ;;  %v503_v9 = vmul.f32 2.0, %v437_v0  ;;  %v519_v10 = vmul.f32 2.0, %v477_v2  ;;  %v439_v11 = vpop.f32.mrb[10].mxu0  ;;  %v770_v14 = vadd.f32 %v739_v5, %v738_v32  ;;  %1194 = vpow2.f32 %v540_v49 }
 0x164   : > { %v479_v12 = vpop.f32.mrb[10].mxu1  ;;  %v1175_v13 = vpop.eup %1174  ;;  %v755_v15 = vsel %vm1713_vm3, 0.0, %v1173_v3  ;;  %v542_v17 = vmul.f32 1.442695, %v502_v60  ;;  %1196 = vpow2.f32 %v572_v54  ;;  %v574_v23 = vmul.f32 1.442695, %v518_v63 }
 0x165   : > { %v441_v18 = vpop.f32.mrb[11].mxu0  ;;  %v481_v19 = vpop.f32.mrb[11].mxu1  ;;  %v778_v21 = vadd.f32 %v755_v15, %v754_v59  ;;  %v740_v22 = vsel %vm1730_vm5, 0.0, %v1175_v13  ;;  %vm657_vm3 = vcmp.eq.s32.totalorder %v1642_v6, %v1601_v34  ;;  %vm1782_vm5 = vmor %vm652_vm10, %vm680_vm1  ;;  %v544_v29 = vmul.f32 1.442695, %v503_v9  ;;  %802 = vst [vmem:[%s1801_s21] sm:$0xff] %v770_v14 }
 0x166   : > { %v1177_v20 = vpop.eup %1176  ;;  %1198 = vpow2.f32 %v542_v17  ;;  %v576_v37 = vmul.f32 1.442695, %v519_v10  ;;  %vm1811_vm10 = vmor %vm653_vm12, %vm687_vm4  ;;  %v504_v43 = vmul.f32 2.0, %v439_v11  ;;  %vm658_vm12 = vcmp.eq.s32.totalorder %v1684_v45, %v1588_v28 }
 0x167   : > { %v1179_v24 = vpop.eup %1178  ;;  %v756_v25 = vsel %vm1743_vm6, 0.0, %v1177_v20  ;;  %vm1795_vm6 = vmor %vm668_vm11, %vm680_vm1  ;;  %1200 = vpow2.f32 %v574_v23  ;;  %810 = vst [vmem:[%s1801_s21 + $0x40] sm:$0xff] %v778_v21  ;;  %v520_v61 = vmul.f32 2.0, %v479_v12  ;;  %v505_v56 = vmul.f32 2.0, %v441_v18 }
 0x168   : > { %v1181_v30 = vpop.eup %1180  ;;  %v741_v31 = vsel %vm1756_vm7, 0.0, %v1179_v24  ;;  %1202 = vpow2.f32 %v544_v29  ;;  %vm1823_vm11 = vmor %vm669_vm14, %vm687_vm4  ;;  %v445_v52 = vpop.f32.mrb[12].mxu0  ;;  %vm2155_vm7 = vcmp.eq.s32.totalorder %v1632_v1, %v1588_v28  ;;  %v546_v55 = vmul.f32 1.442695, %v504_v43 }
 0x169   : > { %v1183_v39 = vpop.eup %1182  ;;  %v771_v40 = vadd.f32 %v741_v31, %v740_v22  ;;  %v757_v41 = vsel %vm1769_vm8, 0.0, %v1181_v30  ;;  %1204 = vpow2.f32 %v576_v37  ;;  %v485_v32 = vpop.f32.mrb[12].mxu1  ;;  %vm1836_vm14 = vmor %vm2155_vm7, %vm680_vm1  ;;  %vm674_vm8 = vcmp.eq.s32.totalorder %v1687_v46, %v1588_v28 }
 0x16a   : > { %v1185_v44 = vpop.eup %1184  ;;  %v779_v47 = vadd.f32 %v757_v41, %v756_v25  ;;  %v742_v48 = vsel %vm1782_vm5, 0.0, %v1183_v39  ;;  %v447_v58 = vpop.f32.mrb[13].mxu0  ;;  %vm2158_vm5 = vcmp.eq.s32.totalorder %v1637_v4, %v1588_v28  ;;  %v578_v0 = vmul.f32 1.442695, %v520_v61 }
 0x16b   : > { %v1187_v53 = vpop.eup %1186  ;;  %v758_v54 = vsel %vm1795_vm6, 0.0, %v1185_v44  ;;  %v487_v59 = vpop.f32.mrb[13].mxu1  ;;  %vm1849_vm6 = vmor %vm2158_vm5, %vm680_vm1  ;;  %vm659_vm7 = vcmp.eq.s32.totalorder %v1684_v45, %v1601_v34  ;;  %v521_v2 = vmul.f32 2.0, %v481_v19  ;;  %803 = vst [vmem:[%s1801_s21 + $0x8] sm:$0xff] %v771_v40  ;;  %1206 = vpow2.f32 %v546_v55 }
 0x16c   : > { %v1189_v33 = vpop.eup %1188  ;;  %v743_v60 = vsel %vm1811_vm10, 0.0, %v1187_v53  ;;  %v449_v3 = vpop.f32.mrb[14].mxu0  ;;  %vm1863_vm10 = vmor %vm655_vm0, %vm687_vm4  ;;  %v548_v12 = vmul.f32 1.442695, %v505_v56  ;;  %vm675_vm5 = vcmp.eq.s32.totalorder %v1687_v46, %v1601_v34  ;;  %811 = vst [vmem:[%s1801_s21 + $0x48] sm:$0xff] %v779_v47  ;;  %1208 = vpow2.f32 %v578_v0 }
 0x16d   : > { %v489_v5 = vpop.f32.mrb[14].mxu1  ;;  %v1191_v8 = vpop.eup %1190  ;;  %v772_v9 = vadd.f32 %v743_v60, %v742_v48  ;;  %v759_v10 = vsel %vm1823_vm11, 0.0, %v1189_v33  ;;  %vm1877_vm0 = vmor %vm671_vm13, %vm687_vm4  ;;  %v580_v18 = vmul.f32 1.442695, %v521_v2  ;;  %v506_v4 = vmul.f32 2.0, %v445_v52 }
 0x16e   : > { %v451_v13 = vpop.f32.mrb[15].mxu0  ;;  %v491_v14 = vpop.f32.mrb[15].mxu1  ;;  %v780_v16 = vadd.f32 %v759_v10, %v758_v54  ;;  %v744_v17 = vsel %vm1836_vm14, 0.0, %v1191_v8  ;;  %vm1888_vm11 = vmor %vm656_vm15, %vm680_vm1  ;;  %1210 = vpow2.f32 %v548_v12  ;;  %vm660_vm15 = vcmp.eq.s32.totalorder %v1701_v50, %v1588_v28 }
 0x16f   : > { %v1193_v15 = vpop.eup %1192  ;;  %vm1899_vm13 = vmor %vm672_vm2, %vm680_vm1  ;;  %1212 = vpow2.f32 %v580_v18  ;;  %v522_v24 = vmul.f32 2.0, %v485_v32  ;;  %804 = vst [vmem:[%s1801_s21 + $0x10] sm:$0xff] %v772_v9  ;;  %v550_v31 = vmul.f32 1.442695, %v506_v4  ;;  %vm676_vm14 = vcmp.eq.s32.totalorder %v1704_v51, %v1588_v28 }
 0x170   : > { %v1195_v19 = vpop.eup %1194  ;;  %v760_v20 = vsel %vm1849_vm6, 0.0, %v1193_v15  ;;  %vm1913_vm2 = vmor %vm657_vm3, %vm687_vm4  ;;  %v507_v36 = vmul.f32 2.0, %v447_v58  ;;  %812 = vst [vmem:[%s1801_s21 + $0x50] sm:$0xff] %v780_v16  ;;  %v523_v42 = vmul.f32 2.0, %v487_v59  ;;  %v508_v53 = vmul.f32 2.0, %v449_v3 }
 0x171   : > { %v1197_v22 = vpop.eup %1196  ;;  %v745_v35 = vsel %vm1863_vm10, 0.0, %v1195_v19  ;;  %vm1927_vm3 = vmor %vm673_vm9, %vm687_vm4  ;;  %v582_v41 = vmul.f32 1.442695, %v522_v24  ;;  %1214 = vpow2.f32 %v550_v31  ;;  %v524_v55 = vmul.f32 2.0, %v489_v5 }
 0x172   : > { %v1199_v25 = vpop.eup %1198  ;;  %v773_v38 = vadd.f32 %v745_v35, %v744_v17  ;;  %v761_v29 = vsel %vm1877_vm0, 0.0, %v1197_v22  ;;  %v552_v47 = vmul.f32 1.442695, %v507_v36  ;;  %v584_v61 = vmul.f32 1.442695, %v523_v42  ;;  %vm1943_vm9 = vmor %vm658_vm12, %vm680_vm1 }
 0x173   : > { %v1201_v37 = vpop.eup %1200  ;;  %v781_v39 = vadd.f32 %v761_v29, %v760_v20  ;;  %v746_v40 = vsel %vm1888_vm11, 0.0, %v1199_v25  ;;  %1216 = vpow2.f32 %v582_v41  ;;  %vm1953_vm6 = vmor %vm674_vm8, %vm680_vm1  ;;  %v509_v56 = vmul.f32 2.0, %v451_v13 }
 0x174   : > { %v1203_v43 = vpop.eup %1202  ;;  %v762_v44 = vsel %vm1899_vm13, 0.0, %v1201_v37  ;;  %805 = vst [vmem:[%s1801_s21 + $0x18] sm:$0xff] %v773_v38  ;;  %1218 = vpow2.f32 %v552_v47  ;;  %vm1962_vm12 = vmor %vm659_vm7, %vm687_vm4  ;;  %v554_v33 = vmul.f32 1.442695, %v508_v53  ;;  %v624_v60 = vadd.s32 120, %v1583_v26 }
 0x175   : > { %v1205_v48 = vpop.eup %1204  ;;  %v747_v49 = vsel %vm1913_vm2, 0.0, %v1203_v43  ;;  %813 = vst [vmem:[%s1801_s21 + $0x58] sm:$0xff] %v781_v39  ;;  %1220 = vpow2.f32 %v584_v61  ;;  %v525_v63 = vmul.f32 2.0, %v491_v14  ;;  %vm1974_vm8 = vmor %vm675_vm5, %vm687_vm4  ;;  %v586_v3 = vmul.f32 1.442695, %v524_v55 }
 0x176   : > { %v774_v7 = vadd.f32 %v747_v49, %v746_v40  ;;  %v763_v52 = vsel %vm1927_vm3, 0.0, %v1205_v48  ;;  %v1207_v58 = vpop.eup %1206  ;;  %v556_v5 = vmul.f32 1.442695, %v509_v56  ;;  %vm661_vm7 = vcmp.eq.s32.totalorder %v1701_v50, %v1601_v34  ;;  %vm1997_vm5 = vmor %vm660_vm15, %vm680_vm1 }
 0x177   : > { %v782_v54 = vadd.f32 %v763_v52, %v762_v44  ;;  %v1209_v0 = vpop.eup %1208  ;;  %v748_v2 = vsel %vm1943_vm9, 0.0, %v1207_v58  ;;  %1222 = vpow2.f32 %v554_v33  ;;  %v588_v9 = vmul.f32 1.442695, %v525_v63  ;;  %vm2007_vm0 = vmor %vm676_vm14, %vm680_vm1 }
 0x178   : > { %v1211_v8 = vpop.eup %1210  ;;  %806 = vst [vmem:[%s1801_s21 + $0x20] sm:$0xff] %v774_v7  ;;  %v764_v26 = vsel %vm1953_vm6, 0.0, %v1209_v0  ;;  %vm677_vm10 = vcmp.eq.s32.totalorder %v1704_v51, %v1601_v34  ;;  %v633_v11 = vadd.s32 %v1586_v27, %v1720_v57  ;;  %1224 = vpow2.f32 %v586_v3  ;;  %vm703_vm11 = vmor %vm661_vm7, %vm687_vm4 }
 0x179   : > { %v1213_v10 = vpop.eup %1212  ;;  %814 = vst [vmem:[%s1801_s21 + $0x60] sm:$0xff] %v782_v54  ;;  %v749_v46 = vsel %vm1962_vm12, 0.0, %v1211_v8  ;;  %v641_v15 = vadd.s32 %v1586_v27, %v624_v60  ;;  %1226 = vpow2.f32 %v556_v5  ;;  %vm719_vm13 = vmor %vm677_vm10, %vm687_vm4 }
 0x17a   : > { %v775_v12 = vadd.f32 %v749_v46, %v748_v2  ;;  %v765_v13 = vsel %vm1974_vm8, 0.0, %v1213_v10  ;;  %1228 = vpow2.f32 %v588_v9  ;;  %vm662_vm15 = vcmp.eq.s32.totalorder %v633_v11, %v1588_v28 }
 0x17b   : > { %v783_v57 = vadd.f32 %v765_v13, %v764_v26  ;;  %v1215_v17 = vpop.eup %1214  ;;  %vm678_vm2 = vcmp.eq.s32.totalorder %v641_v15, %v1588_v28  ;;  %vm663_vm14 = vcmp.eq.s32.totalorder %v633_v11, %v1601_v34  ;;  %vm2032_vm3 = vmor %vm662_vm15, %vm680_vm1  ;;  %vm679_vm9 = vcmp.eq.s32.totalorder %v641_v15, %v1601_v34 }
 0x17c   : > { %v750_v1 = vsel %vm1997_vm5, 0.0, %v1215_v17  ;;  %807 = vst [vmem:[%s1801_s21 + $0x28] sm:$0xff] %v775_v12  ;;  %vm2039_vm6 = vmor %vm678_vm2, %vm680_vm1 }
 0x17d   : > { %v1217_v27 = vpop.eup %1216  ;;  %815 = vst [vmem:[%s1801_s21 + $0x68] sm:$0xff] %v783_v57  ;;  %vm705_vm12 = vmor %vm663_vm14, %vm687_vm4 }
 0x17e   : > { %v1219_v18 = vpop.eup %1218  ;;  %v766_v19 = vsel %vm2007_vm0, 0.0, %v1217_v27  ;;  %vm721_vm8 = vmor %vm679_vm9, %vm687_vm4 }
 0x17f   : > { %v1221_v50 = vpop.eup %1220  ;;  %v751_v20 = vsel %vm703_vm11, 0.0, %v1219_v18 }
 0x180   : > { %v776_v21 = vadd.f32 %v751_v20, %v750_v1  ;;  %v767_v4 = vsel %vm719_vm13, 0.0, %v1221_v50 }
 0x181   : > { %v784_v22 = vadd.f32 %v767_v4, %v766_v19  ;;  %v1223_v23 = vpop.eup %1222 }
 0x182   : > { %v1225_v24 = vpop.eup %1224  ;;  %v752_v25 = vsel %vm2032_vm3, 0.0, %v1223_v23  ;;  %808 = vst [vmem:[%s1801_s21 + $0x30] sm:$0xff] %v776_v21 }
 0x183   : > { %v1227_v38 = vpop.eup %1226  ;;  %v768_v28 = vsel %vm2039_vm6, 0.0, %v1225_v24  ;;  %816 = vst [vmem:[%s1801_s21 + $0x70] sm:$0xff] %v784_v22 }
 0x184   : > { %v1229_v29 = vpop.eup %1228  ;;  %v753_v30 = vsel %vm705_vm12, 0.0, %v1227_v38 }
 0x185   : > { %v777_v31 = vadd.f32 %v753_v30, %v752_v25  ;;  %v769_v36 = vsel %vm721_vm8, 0.0, %v1229_v29 }
 0x186   : > { %v785_v37 = vadd.f32 %v769_v36, %v768_v28 }
 0x187   : > { %809 = vst [vmem:[%s1801_s21 + $0x38] sm:$0xff] %v777_v31 }
 0x188   : > { %817 = vst [vmem:[%s1801_s21 + $0x78] sm:$0xff] %v785_v37 }
 0x189   : > { %1301 = shalt.err (!%p1298_p5)
}
 0x18a   : > { %s1302_s18 = scalar_lea.hbm %s2058_s27, 2048  ;;  %s1306_s22 = scalar_lea.hbm %s2113_s2, 4096 }
 0x18b   : > { %p1303_p9 = scmp.ne.s32.totalorder %s2058_s27, %s1302_s18  ;;  %p1307_p3 = scmp.lt.u32.totalorder %s2058_s27, %s2113_s2 }
 0x18c   : > { %p1308_p7 = scmp.lt.u32.totalorder %s1306_s22, %s1302_s18  ;;  %p1310_p4 = scmp.lt.u32.totalorder %s1302_s18, %s2058_s27 }
 0x18d   : > { %p1304_p1 = pnand %p1303_p9, %p1497_p10 }
 0x18e   : > { %p1309_p13 = por %p1308_p7, %p1307_p3 }
 0x18f   : > { %p1305_p2 = pneg %p1304_p1 }
 0x190   : > { %p1311_p6 = por %p1310_p4, %p1309_p13 }
 0x192   : > { %p1312_p8 = pnand %p1311_p6, %p1305_p2 }
 0x194   : > { %1315 = shalt.err (!%p1312_p8)
}
 0x195   : > { %s1384_s19 = smov 128   ;;  %s1385_s21 = smov 8  }
 0x196   : > { %1059 = dma.vmem_to_hbm [thread:$0]  (%p1497_p10), %s2060_s5, 2048, %s2058_s27, %s886_s23, %s1384_s19, %s1384_s19, %s1385_s21  }
 0x197 PF: > { %s914_s4 = sand.u32 1, %s1354_s9   ;;  %p2189_p12 = scmp.ne.s32.totalorder %s2121_s20, 0 }
 0x198   : > { %p2190_p11 = scmp.ge.s32.totalorder %s1374_s14, 2  ;;  %s915_s6 = scalar_lea.sflag [#allocation4], %s914_s4 }
 0x19a   : > { %p1070_p0 = pnand %p2190_p11, %p2189_p12 }
 0x19c   : > { %1349 = dma.done.wait (!%p1070_p0), %s915_s6, 2048  }
 0x19d   : > { %1351 = vsyncadd (!%p1070_p0), %s915_s6, 4294965248  ;;  %s19_s14 = sadd.s32 1, %s1374_s14   ;;  %s2191_s9 = smov %s1358_s10 }
 0x19e   : > { %p16_p5 = scmp.ge.s32.totalorder %s19_s14, 4   ;;  %s2192_s10 = smov %s1362_s11 }
 0x19f   : > { %s2193_s11 = smov %s1506_s28  ;;  %s2194_s12 = smov %s1370_s13 }
 0x1a0   : > { %s2195_s13 = smov %s2197_s25  ;;  %18 = sbr.rel (!%p16_p5) target bundleno = 7 (0x7), region = 90 }
 0x1a7   :  { %920 = vsyncpa [#allocation3], 1 }
 0x1a8   :  { %922 = vsyncpa [#allocation3 + $0x1], 1 }
 0x1a9   :  { %923 = vsyncpa [#allocation6], 1 }
 0x1aa   :  { %924 = vsyncpa [#allocation4], 1 }
 0x1ab   :  { %926 = vsyncpa [#allocation4 + $0x1], 1 }

</bundles_post_ra>
